<compile_context>
chip_gen: v7x
topology: tpu7x:2x2x1
jax: 0.10.0
libtpu: 0.0.40
codegen_flags: <defaults>
</compile_context>

<pallas_src>
import functools

import jax
import jax.numpy as jnp
from jax.experimental import pallas as pl
from jax.experimental.pallas import tpu as pltpu

_LANE = 128  # hidden (weight) dims are zero-padded to multiples of this


def _round_up(x, m):
    return ((x + m - 1) // m) * m


def _mlp_kernel(x_ref, w1_ref, b1_ref, w2_ref, b2_ref, w3_ref, b3_ref, o_ref):
    """Fused 3-layer MLP on one (blk, d_in) batch tile.

    Matmuls run on the MXU with f32 accumulation; bias-add + ReLU stay in f32 on the
    VPU. MXU operands use the weight dtype (bf16 by default); x is cast in-register.
    """
    cdt = w1_ref.dtype
    x = x_ref[...].astype(cdt)
    h = jnp.dot(x, w1_ref[...], preferred_element_type=jnp.float32) + b1_ref[...]
    h = jnp.maximum(h, 0.0).astype(cdt)
    h = jnp.dot(h, w2_ref[...], preferred_element_type=jnp.float32) + b2_ref[...]
    h = jnp.maximum(h, 0.0).astype(cdt)
    y = jnp.dot(h, w3_ref[...], preferred_element_type=jnp.float32) + b3_ref[...]
    o_ref[...] = y.astype(o_ref.dtype)


def prepare_params(params, compute_dtype=jnp.bfloat16):
    """One-time parameter prep (call once, reuse across forwards).

    Pads the hidden dims (h1, h2) to 128 lanes with zeros and casts weights to the
    MXU compute dtype. d_in / d_out stay unpadded so x / out can be fed unpadded.
    Biases stay f32 (the bias/ReLU epilogue is f32).
    """
    w1, b1, w2, b2, w3, b3 = params
    d_in, h1 = w1.shape
    h2, d_out = w2.shape[1], w3.shape[1]
    h1_p, h2_p = _round_up(h1, _LANE), _round_up(h2, _LANE)

    def pad2(a, rows, cols, dtype):
        return jnp.pad(a, ((0, rows - a.shape[0]), (0, cols - a.shape[1]))).astype(dtype)

    return (
        pad2(w1, d_in, h1_p, compute_dtype),
        pad2(b1, 1, h1_p, jnp.float32),
        pad2(w2, h1_p, h2_p, compute_dtype),
        pad2(b2, 1, h2_p, jnp.float32),
        pad2(w3, h2_p, d_out, compute_dtype),
        pad2(b3, 1, d_out, jnp.float32),
    )


@functools.partial(jax.jit, static_argnames=("block_b",))
def mlp_forward(x, prepared_params, *, block_b=512):
    """x: [B, d_in] f32 (unpadded). prepared_params: output of prepare_params."""
    w1, b1, w2, b2, w3, b3 = prepared_params
    B, d_in = x.shape
    h1_p, h2_p, d_out = w1.shape[1], w2.shape[1], w3.shape[1]
    out_dtype = x.dtype

    # Batch tile: big, sublane-aligned (bf16 packs 16 rows/vreg, f32 packs 8), and
    # sized so the grid has >= 2 steps whenever B allows it (pipeline overlap; lets
    # the "parallel" batch axis shard across v7x's two TensorCores).
    sublane = 16 if w1.dtype == jnp.bfloat16 else 8
    blk = max(sublane, min(block_b, _round_up(pl.cdiv(B, 2), sublane)))
    grid = (pl.cdiv(B, blk),)

    # VMEM working set (x/out double-buffered, weights resident, f32 intermediates);
    # derive the scoped limit from it with headroom, capped for v7x's 64 MiB VMEM.
    c_bytes = jnp.dtype(w1.dtype).itemsize
    x_bytes = jnp.dtype(x.dtype).itemsize
    o_bytes = jnp.dtype(out_dtype).itemsize
    w_bytes = (d_in * h1_p + h1_p * h2_p + h2_p * d_out) * c_bytes
    bias_bytes = (h1_p + h2_p + d_out) * 4
    tile_bytes = (2 * blk * d_in * x_bytes                 # x tile, double-buffered
                  + 2 * blk * d_out * o_bytes              # out tile, double-buffered
                  + 2 * (w_bytes + bias_bytes)             # resident weights/biases
                  + blk * (h1_p + h2_p) * 4                # f32 intermediates
                  + blk * max(h1_p, h2_p) * c_bytes)       # cast intermediate
    vmem_limit = int(min(max(2 * tile_bytes + (2 << 20), 4 << 20), 48 << 20))

    cost = pl.CostEstimate(
        flops=2 * B * (d_in * h1_p + h1_p * h2_p + h2_p * d_out),
        transcendentals=0,
        bytes_accessed=(B * d_in * x_bytes + w_bytes + bias_bytes
                        + B * d_out * o_bytes),
    )

    return pl.pallas_call(
        _mlp_kernel,
        out_shape=jax.ShapeDtypeStruct((B, d_out), out_dtype),
        grid_spec=pltpu.PrefetchScalarGridSpec(
            num_scalar_prefetch=0,
            grid=grid,
            in_specs=[
                pl.BlockSpec((blk, d_in), lambda i: (i, 0)),     # x tile over batch
                pl.BlockSpec((d_in, h1_p), lambda i: (0, 0)),    # w1 (resident)
                pl.BlockSpec((1, h1_p), lambda i: (0, 0)),       # b1
                pl.BlockSpec((h1_p, h2_p), lambda i: (0, 0)),    # w2
                pl.BlockSpec((1, h2_p), lambda i: (0, 0)),       # b2
                pl.BlockSpec((h2_p, d_out), lambda i: (0, 0)),   # w3
                pl.BlockSpec((1, d_out), lambda i: (0, 0)),      # b3
            ],
            out_specs=pl.BlockSpec((blk, d_out), lambda i: (i, 0)),
        ),
        compiler_params=pltpu.CompilerParams(
            dimension_semantics=("parallel",),   # batch axis shards across TCs on v7x
            vmem_limit_bytes=vmem_limit,
        ),
        cost_estimate=cost,
    )(x, w1, b1, w2, b2, w3, b3)


def init_mlp_params(key, input_dim, output_dim, hidden_units=(64, 64), dtype=jnp.float32):
    """Deterministic init matching PyTorch nn.Linear default: U(-1/sqrt(fan_in), +)."""
    dims = (input_dim,) + tuple(hidden_units) + (output_dim,)
    params = []
    for fan_in, fan_out in zip(dims[:-1], dims[1:]):
        key, kw, kb = jax.random.split(key, 3)
        bound = 1.0 / (fan_in ** 0.5)
        # stored as [in, out] == transpose of PyTorch's [out, in] weight
        w = jax.random.uniform(kw, (fan_in, fan_out), dtype, minval=-bound, maxval=bound)
        b = jax.random.uniform(kb, (1, fan_out), dtype, minval=-bound, maxval=bound)
        params.extend([w, b])
    return tuple(params)


def mlp_reference(x, params):
    w1, b1, w2, b2, w3, b3 = params
    h = jnp.maximum(x @ w1 + b1, 0.0)
    h = jnp.maximum(h @ w2 + b2, 0.0)
    return h @ w3 + b3


if __name__ == "__main__":
    key = jax.random.PRNGKey(0)
    k_x, k_p = jax.random.split(key)

    batch, input_dim, output_dim = 8, 32, 16
    hidden_units = (64, 64)

    params = init_mlp_params(k_p, input_dim, output_dim, hidden_units)

    # One-time parameter prep (done outside the per-call path).
    params_f32 = jax.block_until_ready(prepare_params(params, compute_dtype=jnp.float32))
    params_bf16 = jax.block_until_ready(prepare_params(params, compute_dtype=jnp.bfloat16))

    # 1) Small-shape exact-path check (f32 MXU operands).
    x = jax.random.normal(k_x, (batch, input_dim), dtype=jnp.float32)
    out = jax.block_until_ready(mlp_forward(x, params_f32))
    ref = mlp_reference(x, params)
    assert out.shape == (batch, output_dim)
    assert jnp.allclose(out, ref, atol=1e-4, rtol=1e-4), "f32 mismatch vs reference"

    # 2) Larger batch: multi-step grid (grid=(2,)) + bf16 MXU operands, f32 accumulation.
    #    Note: bf16 operands differ from the f32 reference at ~1e-2 relative error.
    xb = jax.random.normal(k_x, (1024, input_dim), dtype=jnp.float32)
    out_bf = jax.block_until_ready(mlp_forward(xb, params_bf16, block_b=512))
    ref_b = mlp_reference(xb, params)
    assert out_bf.shape == ref_b.shape
    assert jnp.allclose(out_bf, ref_b, atol=5e-2, rtol=5e-2), "bf16 mismatch vs reference"

    # 3) Ragged batch (not a multiple of the tile): Pallas masks the partial last block.
    xr = jax.random.normal(k_x, (200, input_dim), dtype=jnp.float32)
    out_r = jax.block_until_ready(mlp_forward(xr, params_f32))
    ref_r = mlp_reference(xr, params)
    assert out_r.shape == ref_r.shape
    assert jnp.allclose(out_r, ref_r, atol=1e-4, rtol=1e-4), "ragged-batch mismatch"

    print("KERNEL_OK")
</pallas_src>

<mosaic_0001>
module attributes {stable_mosaic.version = 11 : i64} {
  func.func @_mlp_kernel(%arg0: i32, %arg1: memref<8x32xf32, #tpu.memory_space<vmem>>, %arg2: memref<32x128xf32, #tpu.memory_space<vmem>>, %arg3: memref<1x128xf32, #tpu.memory_space<vmem>>, %arg4: memref<128x128xf32, #tpu.memory_space<vmem>>, %arg5: memref<1x128xf32, #tpu.memory_space<vmem>>, %arg6: memref<128x16xf32, #tpu.memory_space<vmem>>, %arg7: memref<1x16xf32, #tpu.memory_space<vmem>>, %arg8: memref<8x16xf32, #tpu.memory_space<vmem>>) attributes {dimension_semantics = [#tpu.dimension_semantics<parallel>], iteration_bounds = array<i64: 1>, scalar_prefetch = 0 : i64, scratch_operands = 0 : i64, tpu.core_type = #tpu.core_type<tc>, window_params = [{transform_indices = @transform_0, window_bounds = array<i64: 8, 32>}, {pipeline_mode = #tpu.pipeline_mode<synchronous>, transform_indices = @transform_1, window_bounds = array<i64: 32, 128>}, {pipeline_mode = #tpu.pipeline_mode<synchronous>, transform_indices = @transform_2, window_bounds = array<i64: 1, 128>}, {pipeline_mode = #tpu.pipeline_mode<synchronous>, transform_indices = @transform_3, window_bounds = array<i64: 128, 128>}, {pipeline_mode = #tpu.pipeline_mode<synchronous>, transform_indices = @transform_4, window_bounds = array<i64: 1, 128>}, {pipeline_mode = #tpu.pipeline_mode<synchronous>, transform_indices = @transform_5, window_bounds = array<i64: 128, 16>}, {pipeline_mode = #tpu.pipeline_mode<synchronous>, transform_indices = @transform_6, window_bounds = array<i64: 1, 16>}, {transform_indices = @transform_7, window_bounds = array<i64: 8, 16>}]} {
    %c0 = arith.constant 0 : index
    %c0_0 = arith.constant 0 : index
    %0 = vector.load %arg1[%c0, %c0_0] : memref<8x32xf32, #tpu.memory_space<vmem>>, vector<8x32xf32>
    %c0_1 = arith.constant 0 : index
    %c0_2 = arith.constant 0 : index
    %1 = vector.load %arg2[%c0_1, %c0_2] : memref<32x128xf32, #tpu.memory_space<vmem>>, vector<32x128xf32>
    %cst = arith.constant dense<0.000000e+00> : vector<8x128xf32>
    %2 = tpu.matmul %0, %1, %cst {dimension_numbers = #tpu.dot_dimension_numbers<[1], [0], [0], [1], [0, 0, 1, 1], [], []>} : vector<8x32xf32>, vector<32x128xf32>, vector<8x128xf32> -> vector<8x128xf32>
    %c0_3 = arith.constant 0 : index
    %c0_4 = arith.constant 0 : index
    %3 = vector.load %arg3[%c0_3, %c0_4] : memref<1x128xf32, #tpu.memory_space<vmem>>, vector<1x128xf32>
    %4 = vector.broadcast %3 : vector<1x128xf32> to vector<8x128xf32>
    %5 = arith.addf %2, %4 : vector<8x128xf32>
    %cst_5 = arith.constant 0.000000e+00 : f32
    %6 = vector.broadcast %cst_5 : f32 to vector<8x128xf32>
    %7 = arith.maximumf %5, %6 : vector<8x128xf32>
    %c0_6 = arith.constant 0 : index
    %c0_7 = arith.constant 0 : index
    %8 = vector.load %arg4[%c0_6, %c0_7] : memref<128x128xf32, #tpu.memory_space<vmem>>, vector<128x128xf32>
    %cst_8 = arith.constant dense<0.000000e+00> : vector<8x128xf32>
    %9 = tpu.matmul %7, %8, %cst_8 {dimension_numbers = #tpu.dot_dimension_numbers<[1], [0], [0], [1], [0, 0, 1, 1], [], []>} : vector<8x128xf32>, vector<128x128xf32>, vector<8x128xf32> -> vector<8x128xf32>
    %c0_9 = arith.constant 0 : index
    %c0_10 = arith.constant 0 : index
    %10 = vector.load %arg5[%c0_9, %c0_10] : memref<1x128xf32, #tpu.memory_space<vmem>>, vector<1x128xf32>
    %11 = vector.broadcast %10 : vector<1x128xf32> to vector<8x128xf32>
    %12 = arith.addf %9, %11 : vector<8x128xf32>
    %cst_11 = arith.constant 0.000000e+00 : f32
    %13 = vector.broadcast %cst_11 : f32 to vector<8x128xf32>
    %14 = arith.maximumf %12, %13 : vector<8x128xf32>
    %c0_12 = arith.constant 0 : index
    %c0_13 = arith.constant 0 : index
    %15 = vector.load %arg6[%c0_12, %c0_13] : memref<128x16xf32, #tpu.memory_space<vmem>>, vector<128x16xf32>
    %cst_14 = arith.constant dense<0.000000e+00> : vector<8x16xf32>
    %16 = tpu.matmul %14, %15, %cst_14 {dimension_numbers = #tpu.dot_dimension_numbers<[1], [0], [0], [1], [0, 0, 1, 1], [], []>} : vector<8x128xf32>, vector<128x16xf32>, vector<8x16xf32> -> vector<8x16xf32>
    %c0_15 = arith.constant 0 : index
    %c0_16 = arith.constant 0 : index
    %17 = vector.load %arg7[%c0_15, %c0_16] : memref<1x16xf32, #tpu.memory_space<vmem>>, vector<1x16xf32>
    %18 = vector.broadcast %17 : vector<1x16xf32> to vector<8x16xf32>
    %19 = arith.addf %16, %18 : vector<8x16xf32>
    %c0_17 = arith.constant 0 : index
    %c0_18 = arith.constant 0 : index
    %20 = vector.load %arg8[%c0_17, %c0_18] : memref<8x16xf32, #tpu.memory_space<vmem>>, vector<8x16xf32>
    tpu.vector_store %arg8[%c0_17, %c0_18], %19 {strides = array<i32>} : memref<8x16xf32, #tpu.memory_space<vmem>>, vector<8x16xf32>,
    return
  }
  func.func @transform_0(%arg0: i32) -> (i32, i32) {
    %c0_i32 = arith.constant 0 : i32
    %c0_i32_0 = arith.constant 0 : i32
    return %arg0, %c0_i32 : i32, i32
  }
  func.func @transform_1(%arg0: i32) -> (i32, i32) {
    %c0_i32 = arith.constant 0 : i32
    %c0_i32_0 = arith.constant 0 : i32
    %c0_i32_1 = arith.constant 0 : i32
    return %c0_i32, %c0_i32_0 : i32, i32
  }
  func.func @transform_2(%arg0: i32) -> (i32, i32) {
    %c0_i32 = arith.constant 0 : i32
    %c0_i32_0 = arith.constant 0 : i32
    %c0_i32_1 = arith.constant 0 : i32
    return %c0_i32, %c0_i32_0 : i32, i32
  }
  func.func @transform_3(%arg0: i32) -> (i32, i32) {
    %c0_i32 = arith.constant 0 : i32
    %c0_i32_0 = arith.constant 0 : i32
    %c0_i32_1 = arith.constant 0 : i32
    return %c0_i32, %c0_i32_0 : i32, i32
  }
  func.func @transform_4(%arg0: i32) -> (i32, i32) {
    %c0_i32 = arith.constant 0 : i32
    %c0_i32_0 = arith.constant 0 : i32
    %c0_i32_1 = arith.constant 0 : i32
    return %c0_i32, %c0_i32_0 : i32, i32
  }
  func.func @transform_5(%arg0: i32) -> (i32, i32) {
    %c0_i32 = arith.constant 0 : i32
    %c0_i32_0 = arith.constant 0 : i32
    %c0_i32_1 = arith.constant 0 : i32
    return %c0_i32, %c0_i32_0 : i32, i32
  }
  func.func @transform_6(%arg0: i32) -> (i32, i32) {
    %c0_i32 = arith.constant 0 : i32
    %c0_i32_0 = arith.constant 0 : i32
    %c0_i32_1 = arith.constant 0 : i32
    return %c0_i32, %c0_i32_0 : i32, i32
  }
  func.func @transform_7(%arg0: i32) -> (i32, i32) {
    %c0_i32 = arith.constant 0 : i32
    %c0_i32_0 = arith.constant 0 : i32
    return %arg0, %c0_i32 : i32, i32
  }
}

</mosaic_0001>

<bundles_post_ra>
// kernel: mlp_forward.1
= control target key start
LH: loop header
LB: loop body
LE: loop exit
PB: predicated region body
PF: predicated region fallthrough
CT: control target
= control target key end

     0   :  { %12 = vsyncpa [#allocation3], 0  ;;  %s765_s0 = inlined_call_operand.vmem [shape: f32[8,32], index: 0, kind: input, shape index: {}]   ;;  %s766_s1 = inlined_call_operand.hbm [shape: f32[32,128], index: 1, kind: input, shape index: {}]   ;;  %s767_s2 = inlined_call_operand.vmem [shape: f32[1,128], index: 2, kind: input, shape index: {}]   ;;  %s768_s3 = inlined_call_operand.vmem [shape: f32[128,128], index: 3, kind: input, shape index: {}]   ;;  %s769_s4 = inlined_call_operand.vmem [shape: f32[1,128], index: 4, kind: input, shape index: {}]   ;;  %s770_s5 = inlined_call_operand.vmem [shape: f32[128,16], index: 5, kind: input, shape index: {}]   ;;  %s771_s6 = inlined_call_operand.vmem [shape: f32[1,16], index: 6, kind: input, shape index: {}]   ;;  %s772_s7 = inlined_call_operand.hbm [shape: f32[8,16], index: 7, kind: output, shape index: {}]  }
   0x1   :  { %13 = vsyncpa [#allocation4], 0  ;;  %s565_s24 = smov [#allocation2]   ;;  %s517_s28 = scalar_lea.hbm %s766_s1, 512 }
   0x2   :  { %s21_s25 = sshll.u32 %s565_s24, 4  ;;  %p518_p0 = scmp.ne.s32.totalorder %s766_s1, %s517_s28  ;;  %s22_s25 = int_to_ptr.vmem [resolvable:$true] %s21_s25 }
   0x3   :  { %p521_p1 = scmp.lt.u32.totalorder %s517_s28, %s766_s1 }
   0x5   :  { %p523_p2 = pnand %p521_p1, %p518_p0 }
   0x7   :  { %526 = shalt.err (!%p523_p2)
}
   0x8   :  { %s527_s10 = scalar_lea.vmem %s22_s25, 512  ;;  %p532_p4 = scmp.lt.s32.totalorder %s22_s25, %s22_s25 }
   0x9   :  { %p528_p3 = scmp.ne.s32.totalorder %s22_s25, %s527_s10  ;;  %p533_p5 = scmp.lt.s32.totalorder %s527_s10, %s527_s10 }
   0xb   :  { %p534_p6 = por %p533_p5, %p532_p4 }
   0xd   :  { %p535_p7 = pnand %p534_p6, %p528_p3 }
   0xf   :  { %538 = shalt.err (!%p535_p7)
}
  0x10   :  { %s566_s11 = smov 128   ;;  %s567_s12 = smov 8  }
  0x11   :  { %27 = dma.hbm_to_vmem [thread:$0]  %s766_s1, 512, %s22_s25, [#allocation3], %s566_s11, %s566_s11, %s567_s12  }
  0x12   :  { %561 = dma.done.wait [#allocation3], 512  }
  0x13   :  { %562 = vsyncadd [#allocation3], 4294966784  ;;  %v568_v0 = vmov 0.0|0.0   ;;  %vm569_vm0 = vmmov 0   ;;  %v570_v1 = vmov 0.0   ;;  %v42_v2 = vld [vmem:[#allocation2] sm:$0xff] }
  0x14   :  { %456 = vmatprep.subr.bf16.mxu0 %v568_v0  ;;  %383 = vmatprep.mubr.msk.f32.mxu0 %vm569_vm0, %v570_v1  ;;  %v43_v3 = vld [vmem:[#allocation2 + $0x8] sm:$0xff]  ;;  %v44_v4 = vld [vmem:[#allocation2 + $0x10] sm:$0xff]  ;;  %v45_v6 = vld [vmem:[#allocation2 + $0x18] sm:$0xff]  ;;  %vm53_vm1 = vcmask 261120   ;;  %s571_s9 = smov [#allocation5]   ;;  %vm315_vm2 = vcmask 130048  }
  0x15   :  { %462 = vmatprep.subr.bf16.mxu1 %v568_v0  ;;  %418 = vmatprep.mubr.msk.f32.mxu1 %vm569_vm0, %v570_v1  ;;  %v457_v5 = vpack.c.bf16 %v43_v3, %v42_v2  ;;  %v128_v7 = vld [vmem:[%s768_s3] sm:$0xff]  ;;  %v129_v8 = vld [vmem:[%s768_s3 + $0x8] sm:$0xff]  ;;  %v130_v9 = vld [vmem:[%s768_s3 + $0x10] sm:$0xff]  ;;  %v460_v11 = vpack.c.bf16 %v45_v6, %v44_v4  ;;  %s323_s10 = sshll.u32 %s571_s9, 4  ;;  %s324_s10 = int_to_ptr.vmem [resolvable:$true] %s323_s10 }
  0x16   :  { %v131_v10 = vld [vmem:[%s768_s3 + $0x18] sm:$0xff]  ;;  %v463_v12 = vpack.c.bf16 %v129_v8, %v128_v7  ;;  %v132_v14 = vld [vmem:[%s768_s3 + $0x20] sm:$0xff]  ;;  %v133_v15 = vld [vmem:[%s768_s3 + $0x28] sm:$0xff]  ;;  %p544_p9 = scmp.lt.s32.totalorder %s324_s10, %s324_s10 }
  0x17   :  { %458 = vmatpush3.bf16.msra.mxu0 %v457_v5  ;;  %v466_v13 = vpack.c.bf16 %v131_v10, %v130_v9  ;;  %v41_v16 = vld [vmem:[%s765_s0] sm:$0xff]  ;;  %v469_v17 = vpack.c.bf16 %v133_v15, %v132_v14  ;;  %v134_v18 = vld [vmem:[%s768_s3 + $0x30] sm:$0xff]  ;;  %v135_v19 = vld [vmem:[%s768_s3 + $0x38] sm:$0xff] }
  0x18   :  { %459 = vmatprep.subr.bf16.mxu0 %v568_v0  ;;  %464 = vmatpush3.bf16.msra.mxu1 %v463_v12  ;;  %v472_v20 = vpack.c.bf16 %v135_v19, %v134_v18  ;;  %v136_v21 = vld [vmem:[%s768_s3 + $0x40] sm:$0xff]  ;;  %v137_v22 = vld [vmem:[%s768_s3 + $0x48] sm:$0xff]  ;;  %v138_v24 = vld [vmem:[%s768_s3 + $0x50] sm:$0xff] }
  0x19   :  { %465 = vmatprep.subr.bf16.mxu1 %v568_v0  ;;  %v475_v23 = vpack.c.bf16 %v137_v22, %v136_v21  ;;  %v139_v25 = vld [vmem:[%s768_s3 + $0x58] sm:$0xff]  ;;  %v140_v27 = vld [vmem:[%s768_s3 + $0x60] sm:$0xff]  ;;  %v141_v28 = vld [vmem:[%s768_s3 + $0x68] sm:$0xff] }
  0x1a   :  { %v478_v26 = vpack.c.bf16 %v139_v25, %v138_v24  ;;  %v481_v29 = vpack.c.bf16 %v141_v28, %v140_v27  ;;  %v142_v30 = vld [vmem:[%s768_s3 + $0x70] sm:$0xff]  ;;  %v143_v31 = vld [vmem:[%s768_s3 + $0x78] sm:$0xff]  ;;  %v222_v33 = vld [vmem:[%s770_s5] sm:$0xff] }
  0x1b   :  { %461 = vmatpush3.bf16.msra.mxu0 %v460_v11  ;;  %v484_v32 = vpack.c.bf16 %v143_v31, %v142_v30  ;;  %v223_v34 = vld [vmem:[%s770_s5 + $0x8] sm:$0xff]  ;;  %v224_v35 = vld [vmem:[%s770_s5 + $0x10] sm:$0xff]  ;;  %v225_v37 = vld [vmem:[%s770_s5 + $0x18] sm:$0xff] }
  0x1c   :  { %486 = vmatprep.subr.bf16.mxu0 %v568_v0  ;;  %467 = vmatpush3.bf16.msra.mxu1 %v466_v13  ;;  %v487_v36 = vpack.c.bf16 %v223_v34, %v222_v33  ;;  %v490_v38 = vpack.c.bf16 %v225_v37, %v224_v35  ;;  %v226_v39 = vld [vmem:[%s770_s5 + $0x20] sm:$0xff]  ;;  %v227_v40 = vld [vmem:[%s770_s5 + $0x28] sm:$0xff]  ;;  %v228_v42 = vld [vmem:[%s770_s5 + $0x30] sm:$0xff] }
  0x1d   :  { %468 = vmatprep.subr.bf16.mxu1 %v568_v0  ;;  %v493_v41 = vpack.c.bf16 %v227_v40, %v226_v39  ;;  %v229_v43 = vld [vmem:[%s770_s5 + $0x38] sm:$0xff]  ;;  %v230_v45 = vld [vmem:[%s770_s5 + $0x40] sm:$0xff]  ;;  %v231_v46 = vld [vmem:[%s770_s5 + $0x48] sm:$0xff] }
  0x1e   :  { %384 = vmatmul.mubr.msk.f32.vlgmr.msra.gmra.mrb[0].mxu0 %vm53_vm1, %v41_v16  ;;  %v496_v44 = vpack.c.bf16 %v229_v43, %v228_v42  ;;  %v499_v47 = vpack.c.bf16 %v231_v46, %v230_v45  ;;  %v232_v48 = vld [vmem:[%s770_s5 + $0x50] sm:$0xff]  ;;  %v233_v49 = vld [vmem:[%s770_s5 + $0x58] sm:$0xff]  ;;  %v234_v51 = vld [vmem:[%s770_s5 + $0x60] sm:$0xff] }
  0x1f   :  { %453 = vmatprep.mubr.msk.f32.mxu0 %vm569_vm0, %v570_v1  ;;  %488 = vmatpush3.bf16.msra.mxu0 %v487_v36  ;;  %v502_v50 = vpack.c.bf16 %v233_v49, %v232_v48  ;;  %v235_v52 = vld [vmem:[%s770_s5 + $0x68] sm:$0xff]  ;;  %v332_v54 = vld [vmem:[%s767_s2] ss:$0 sm:$0xff]  ;;  %v236_v59 = vld [vmem:[%s770_s5 + $0x70] sm:$0xff] }
  0x20   :  { %470 = vmatpush3.bf16.msra.mxu1 %v469_v17  ;;  %489 = vmatprep.subr.bf16.mxu0 %v568_v0  ;;  %v505_v53 = vpack.c.bf16 %v235_v52, %v234_v51  ;;  %v237_v60 = vld [vmem:[%s770_s5 + $0x78] sm:$0xff]  ;;  %v334_v62 = vld [vmem:[%s769_s4] ss:$0 sm:$0xff]  ;;  %s539_s5 = scalar_lea.vmem %s324_s10, 128 }
  0x21   :  { %471 = vmatprep.subr.bf16.mxu1 %v568_v0  ;;  %v508_v61 = vpack.c.bf16 %v237_v60, %v236_v59  ;;  %v335_v3 = vld [vmem:[%s771_s6] ss:$0 sm:$0xff]  ;;  %p540_p8 = scmp.ne.s32.totalorder %s324_s10, %s539_s5  ;;  %p545_p10 = scmp.lt.s32.totalorder %s539_s5, %s539_s5 }
  0x23   :  { %491 = vmatpush3.bf16.msra.mxu0 %v490_v38  ;;  %p546_p11 = por %p545_p10, %p544_p9 }
  0x24   :  { %473 = vmatpush3.bf16.msra.mxu1 %v472_v20  ;;  %492 = vmatprep.subr.bf16.mxu0 %v568_v0 }
  0x25   :  { %474 = vmatprep.subr.bf16.mxu1 %v568_v0  ;;  %p547_p12 = pnand %p546_p11, %p540_p8 }
  0x27   :  { %494 = vmatpush3.bf16.msra.mxu0 %v493_v41 }
  0x28   :  { %476 = vmatpush3.bf16.msra.mxu1 %v475_v23  ;;  %495 = vmatprep.subr.bf16.mxu0 %v568_v0 }
  0x29   :  { %477 = vmatprep.subr.bf16.mxu1 %v568_v0 }
  0x2b   :  { %497 = vmatpush3.bf16.msra.mxu0 %v496_v44 }
  0x2c   :  { %479 = vmatpush3.bf16.msra.mxu1 %v478_v26  ;;  %498 = vmatprep.subr.bf16.mxu0 %v568_v0 }
  0x2d   :  { %480 = vmatprep.subr.bf16.mxu1 %v568_v0 }
  0x2f   :  { %500 = vmatpush3.bf16.msra.mxu0 %v499_v47 }
  0x30   :  { %482 = vmatpush3.bf16.msra.mxu1 %v481_v29  ;;  %501 = vmatprep.subr.bf16.mxu0 %v568_v0 }
  0x31   :  { %483 = vmatprep.subr.bf16.mxu1 %v568_v0 }
  0x33   :  { %503 = vmatpush3.bf16.msra.mxu0 %v502_v50 }
  0x34   :  { %485 = vmatpush3.bf16.msra.mxu1 %v484_v32  ;;  %504 = vmatprep.subr.bf16.mxu0 %v568_v0 }
  0x37   :  { %506 = vmatpush3.bf16.msra.mxu0 %v505_v53 }
  0x38   :  { %507 = vmatprep.subr.bf16.mxu0 %v568_v0 }
  0x3b   :  { %509 = vmatpush3.bf16.msra.mxu0 %v508_v61 }
  0xf1   :  { %v123_v55 = vpop.f32.mrb[0].mxu0 }
  0xf2   :  { %v124_v56 = vadd.f32 %v332_v54, %v123_v55  ;;  %v385_v57 = vpop.f32.mrb[1].mxu0 }
  0xf4   :  { %v127_v58 = vmax.f32 %v124_v56, 0.0 }
  0xf6   :  { %419 = vmatmul.mubr.f32.vlgmr.msra.gmra.mrb[0].mxu1 %v127_v58 }
 0x1c9   :  { %v217_v63 = vpop.f32.mrb[0].mxu1 }
 0x1ca   :  { %v218_v0 = vadd.f32 %v334_v62, %v217_v63  ;;  %v420_v1 = vpop.f32.mrb[1].mxu1 }
 0x1cc   :  { %v221_v2 = vmax.f32 %v218_v0, 0.0 }
 0x1ce   :  { %454 = vmatmul.mubr.f32.vlgmr.msra.gmra.mrb[2].mxu0 %v221_v2 }
 0x2a1   :  { %v311_v4 = vpop.f32.mrb[2].mxu0 }
 0x2a2   :  { %v312_v5 = vadd.f32 %v335_v3, %v311_v4  ;;  %v455_v6 = vpop.f32.mrb[3].mxu0 }
 0x2a4   :  { %316 = vst.msk [vmem:[#allocation5] sm:$0xff] %vm315_vm2, %v312_v5 }
 0x2a5   :  { %550 = shalt.err (!%p547_p12)
}
 0x2a6   :  { %s551_s12 = scalar_lea.hbm %s772_s7, 128 }
 0x2a7   :  { %p552_p13 = scmp.ne.s32.totalorder %s772_s7, %s551_s12  ;;  %p555_p0 = scmp.lt.u32.totalorder %s551_s12, %s772_s7 }
 0x2a9   :  { %p557_p1 = pnand %p555_p0, %p552_p13 }
 0x2ab   :  { %560 = shalt.err (!%p557_p1)
}
 0x2ac   :  { %326 = dma.vmem_to_hbm [thread:$0]  %s324_s10, 128, %s772_s7, [#allocation4]  }
 0x2ad   :  { %563 = dma.done.wait [#allocation4], 128  }
 0x2ae   :  { %564 = vsyncadd [#allocation4], 4294967168 }
 0x2af   :  { %330 = vsyncpa [#allocation3], 1 }
 0x2b0   :  { %331 = vsyncpa [#allocation4], 1 }

</bundles_post_ra>
